<compile_context>
chip_gen: v7x
topology: tpu7x:2x2x1
jax: 0.10.0
libtpu: 0.0.40
codegen_flags: <defaults>
</compile_context>

<pallas_src>
import functools
import math

import jax
import jax.numpy as jnp
from jax import lax
from jax.experimental import pallas as pl
from jax.experimental.pallas import tpu as pltpu


def _round_up(x, m):
    return (x + m - 1) // m * m


def _window_matrix(num_taps, size, out_len, pad):
    """B[k, r] = 1.0 iff unpadded row r lies in tap k's output window.

    With zero padding, out-of-bounds rows contribute nothing, so the padded
    windowed sum equals B @ x over the unpadded image.
    """
    k = jnp.arange(num_taps)[:, None]
    r = jnp.arange(size)[None, :]
    return ((r >= k - pad) & (r <= k - pad + out_len - 1)).astype(jnp.float32)


# ------------------------------ fused kernel --------------------------------

def _fused_affine_kernel(x_ref, w_ref, b_ref, o_ref):
    # One lane-dense GEMM: (Nb, HW) @ (HW, Np), bf16 operands, f32 accumulate.
    x = x_ref[...].astype(jnp.bfloat16)
    acc = jnp.dot(x, w_ref[...], preferred_element_type=jnp.float32)
    o_ref[...] = acc + b_ref[...]            # bias add stays f32 (v5e-safe)


def _pick_batch_block(n):
    """Batch rows per grid step: sublane-aligned, MXU-height friendly."""
    if n > 1024:
        return 256                           # full MXU height on v6e/v7x
    if n > 256:
        return 128                           # >= 2 grid steps, v5e MXU height
    if n >= 16:
        return _round_up((n + 1) // 2, 8)    # >= 2 steps -> both v7x TCs busy
    return n                                 # tiny batch: one full-dim block


@functools.partial(jax.jit, static_argnums=(2,))
def xray_model_forward(x, prep, num_outputs):
    """x: (N, 1, H, W) f32 -> (N, num_outputs) f32."""
    N, C, H, W = x.shape
    assert C == 1
    HW = H * W
    w_tot = prep["w"]                        # (HW, Np) bf16, folded network
    b_tot = prep["b"]                        # (1, Np)  f32, folded bias
    assert w_tot.shape[0] == HW
    Np = w_tot.shape[1]

    nb = _pick_batch_block(N)
    n_pad = _round_up(N, nb)
    x_flat = x.reshape(N, HW)                # lane-dense (last dim = H*W)
    if n_pad != N:
        x_flat = jnp.pad(x_flat, ((0, n_pad - N), (0, 0)))

    out = pl.pallas_call(
        _fused_affine_kernel,
        out_shape=jax.ShapeDtypeStruct((n_pad, Np), jnp.float32),
        grid=(n_pad // nb,),
        in_specs=[
            pl.BlockSpec((nb, HW), lambda i: (i, 0)),    # batch tile of images
            pl.BlockSpec((HW, Np), lambda i: (0, 0)),    # folded weight (resident)
            pl.BlockSpec((1, Np), lambda i: (0, 0)),     # folded bias   (resident)
        ],
        out_specs=pl.BlockSpec((nb, Np), lambda i: (i, 0)),
        compiler_params=pltpu.CompilerParams(
            dimension_semantics=("parallel",)),
    )(x_flat, w_tot, b_tot)
    return out[:N, :num_outputs]


# -------------------- one-time parameter preprocessing ----------------------

def preprocess_params(params, height, width, pad=1):
    """Fold conv1 + GAP + surrogate-DenseNet Linear + classifier1/2 into one
    affine map (exact: the forward pass contains no nonlinearity)."""
    conv_w = params["conv1_w"]                        # (3, 1, 32, 32)
    Cout, Cin, KH, KW = conv_w.shape
    assert Cin == 1
    OH = height + 2 * pad - KH + 1
    OW = width + 2 * pad - KW + 1
    assert OH >= 1 and OW >= 1
    inv_area = 1.0 / float(OH * OW)

    # conv1 fused with global average pooling as a per-pixel weight:
    #   pooled[n, c] = sum_{r,s} x[n, r, s] * w_pix[c, r, s]
    b_rows = _window_matrix(KH, height, OH, pad)      # (KH, H)
    b_cols = _window_matrix(KW, width, OW, pad)       # (KW, W)
    wc = conv_w.reshape(Cout, KH, KW).astype(jnp.float32)
    w_pix = jnp.einsum("kr,ckl,ls->crs", b_rows, wc, b_cols) * inv_area
    w_pix = w_pix.reshape(Cout, height * width)       # (3, HW)

    dn_w, dn_b = params["dn_w"], params["dn_b"]       # (3, 1000), (1000,)
    fc1_w, fc1_b = params["fc1_w"], params["fc1_b"]   # (256, 1000), (256,)
    fc2_w, fc2_b = params["fc2_w"], params["fc2_b"]   # (no, 256), (no,)

    # Chain the affine layers:  y = pooled @ A + b_chain
    A = dn_w @ fc1_w.T @ fc2_w.T                      # (3, no)
    b_chain = dn_b @ fc1_w.T @ fc2_w.T + fc1_b @ fc2_w.T + fc2_b   # (no,)

    w_total = w_pix.T @ A                             # (HW, no)

    num_outputs = fc2_w.shape[0]
    np_lanes = _round_up(num_outputs, 128)            # lane-dense output width
    w_padded = jnp.zeros((height * width, np_lanes), jnp.float32)
    w_padded = w_padded.at[:, :num_outputs].set(w_total)
    b_padded = jnp.zeros((1, np_lanes), jnp.float32)
    b_padded = b_padded.at[0, :num_outputs].set(b_chain)
    return {"w": w_padded.astype(jnp.bfloat16), "b": b_padded}


# ------------------------------ param init ----------------------------------

def init_params(key, num_outputs=2):
    ks = jax.random.split(key, 8)

    def xavier(k, shape, fan_in, fan_out):
        lim = math.sqrt(6.0 / (fan_in + fan_out))
        return jax.random.uniform(k, shape, jnp.float32, -lim, lim)

    # Conv2d(1, 3, 32) default (kaiming-uniform-ish) init, deterministic.
    conv_bound = 1.0 / math.sqrt(1 * 32 * 32)
    conv1_w = jax.random.uniform(ks[0], (3, 1, 32, 32), jnp.float32,
                                 -conv_bound, conv_bound)

    # Surrogate DenseNet head: Linear(3 -> 1000).
    dn_w = xavier(ks[1], (3, 1000), 3, 1000)
    dn_b = jnp.zeros((1000,), jnp.float32)

    # classifier1: Linear(1000 -> 256), xavier_uniform weights (as in __init__).
    fc1_w = xavier(ks[2], (256, 1000), 1000, 256)     # PyTorch layout (out, in)
    fc1_b = jax.random.uniform(ks[3], (256,), jnp.float32,
                               -1.0 / math.sqrt(1000), 1.0 / math.sqrt(1000))

    # classifier2: Linear(256 -> num_outputs), xavier_uniform weights.
    fc2_w = xavier(ks[4], (num_outputs, 256), 256, num_outputs)
    fc2_b = jax.random.uniform(ks[5], (num_outputs,), jnp.float32,
                               -1.0 / math.sqrt(256), 1.0 / math.sqrt(256))

    return {"conv1_w": conv1_w, "dn_w": dn_w, "dn_b": dn_b,
            "fc1_w": fc1_w, "fc1_b": fc1_b, "fc2_w": fc2_w, "fc2_b": fc2_b}


# ------------------------------ reference ----------------------------------

def _reference_forward(x, p):
    out = lax.conv_general_dilated(
        x, p["conv1_w"], window_strides=(1, 1), padding=((1, 1), (1, 1)),
        dimension_numbers=("NCHW", "OIHW", "NCHW"))
    pooled = jnp.mean(out, axis=(2, 3))
    feat = pooled @ p["dn_w"] + p["dn_b"]
    h = feat @ p["fc1_w"].T + p["fc1_b"]
    return h @ p["fc2_w"].T + p["fc2_b"]


if __name__ == "__main__":
    key = jax.random.PRNGKey(0)
    k_x, k_p = jax.random.split(key)

    # batch=2, 1 channel, 64x64 image (kernel_size=32 conv needs spatial >= 31).
    x = jax.random.normal(k_x, (2, 1, 64, 64), jnp.float32)
    params = init_params(k_p, num_outputs=2)
    prep = preprocess_params(params, height=64, width=64)

    y = xray_model_forward(x, prep, 2)
    y = jax.block_until_ready(y)
    assert y.shape == (2, 2), y.shape

    y_ref = _reference_forward(x, params)
    # bf16 matmul operands with f32 accumulation: keep a small extra margin.
    assert jnp.allclose(y, y_ref, atol=2e-3, rtol=2e-3), (y, y_ref)

    print("KERNEL_OK")
</pallas_src>

<mosaic_0001>
module attributes {stable_mosaic.version = 11 : i64} {
  func.func @_fused_affine_kernel(%arg0: i32, %arg1: memref<2x4096xf32, #tpu.memory_space<vmem>>, %arg2: memref<4096x128xbf16, #tpu.memory_space<vmem>>, %arg3: memref<1x128xf32, #tpu.memory_space<vmem>>, %arg4: memref<2x128xf32, #tpu.memory_space<vmem>>) attributes {dimension_semantics = [#tpu.dimension_semantics<parallel>], iteration_bounds = array<i64: 1>, scalar_prefetch = 0 : i64, scratch_operands = 0 : i64, tpu.core_type = #tpu.core_type<tc>, window_params = [{transform_indices = @transform_0, window_bounds = array<i64: 2, 4096>}, {pipeline_mode = #tpu.pipeline_mode<synchronous>, transform_indices = @transform_1, window_bounds = array<i64: 4096, 128>}, {pipeline_mode = #tpu.pipeline_mode<synchronous>, transform_indices = @transform_2, window_bounds = array<i64: 1, 128>}, {transform_indices = @transform_3, window_bounds = array<i64: 2, 128>}]} {
    %c0 = arith.constant 0 : index
    %c0_0 = arith.constant 0 : index
    %0 = vector.load %arg1[%c0, %c0_0] : memref<2x4096xf32, #tpu.memory_space<vmem>>, vector<2x4096xf32>
    %1 = arith.truncf %0 : vector<2x4096xf32> to vector<2x4096xbf16>
    %c0_1 = arith.constant 0 : index
    %c0_2 = arith.constant 0 : index
    %2 = vector.load %arg2[%c0_1, %c0_2] : memref<4096x128xbf16, #tpu.memory_space<vmem>>, vector<4096x128xbf16>
    %cst = arith.constant dense<0.000000e+00> : vector<2x128xf32>
    %3 = tpu.matmul %1, %2, %cst {dimension_numbers = #tpu.dot_dimension_numbers<[1], [0], [0], [1], [0, 0, 1, 1], [], []>} : vector<2x4096xbf16>, vector<4096x128xbf16>, vector<2x128xf32> -> vector<2x128xf32>
    %c0_3 = arith.constant 0 : index
    %c0_4 = arith.constant 0 : index
    %4 = vector.load %arg3[%c0_3, %c0_4] : memref<1x128xf32, #tpu.memory_space<vmem>>, vector<1x128xf32>
    %5 = vector.broadcast %4 : vector<1x128xf32> to vector<2x128xf32>
    %6 = arith.addf %3, %5 : vector<2x128xf32>
    %c0_5 = arith.constant 0 : index
    %c0_6 = arith.constant 0 : index
    %7 = vector.load %arg4[%c0_5, %c0_6] : memref<2x128xf32, #tpu.memory_space<vmem>>, vector<2x128xf32>
    tpu.vector_store %arg4[%c0_5, %c0_6], %6 {strides = array<i32>} : memref<2x128xf32, #tpu.memory_space<vmem>>, vector<2x128xf32>,
    return
  }
  func.func @transform_0(%arg0: i32) -> (i32, i32) {
    %c0_i32 = arith.constant 0 : i32
    %c0_i32_0 = arith.constant 0 : i32
    return %arg0, %c0_i32 : i32, i32
  }
  func.func @transform_1(%arg0: i32) -> (i32, i32) {
    %c0_i32 = arith.constant 0 : i32
    %c0_i32_0 = arith.constant 0 : i32
    %c0_i32_1 = arith.constant 0 : i32
    return %c0_i32, %c0_i32_0 : i32, i32
  }
  func.func @transform_2(%arg0: i32) -> (i32, i32) {
    %c0_i32 = arith.constant 0 : i32
    %c0_i32_0 = arith.constant 0 : i32
    %c0_i32_1 = arith.constant 0 : i32
    return %c0_i32, %c0_i32_0 : i32, i32
  }
  func.func @transform_3(%arg0: i32) -> (i32, i32) {
    %c0_i32 = arith.constant 0 : i32
    %c0_i32_0 = arith.constant 0 : i32
    return %arg0, %c0_i32 : i32, i32
  }
}

</mosaic_0001>

<bundles_post_ra>
// kernel: xray_model_forward.1
= control target key start
LH: loop header
LB: loop body
LE: loop exit
PB: predicated region body
PF: predicated region fallthrough
CT: control target
= control target key end

     0   :  { %8 = vsyncpa [#allocation3], 0  ;;  %s3977_s0 = inlined_call_operand.vmem [shape: f32[2,4096], index: 0, kind: input, shape index: {}]   ;;  %s3978_s1 = inlined_call_operand.hbm [shape: bf16[4096,128], index: 1, kind: input, shape index: {}]   ;;  %s3979_s2 = inlined_call_operand.vmem [shape: f32[1,128], index: 2, kind: input, shape index: {}]   ;;  %s3980_s3 = inlined_call_operand.hbm [shape: f32[2,128], index: 3, kind: output, shape index: {}]  }
   0x1   :  { %9 = vsyncpa [#allocation4], 0  ;;  %s3883_s12 = smov [#allocation2]   ;;  %s3835_s16 = scalar_lea.hbm %s3978_s1, 32768 }
   0x2   :  { %s17_s13 = sshll.u32 %s3883_s12, 4  ;;  %p3836_p0 = scmp.ne.s32.totalorder %s3978_s1, %s3835_s16  ;;  %s18_s13 = int_to_ptr.vmem [resolvable:$true] %s17_s13 }
   0x3   :  { %p3839_p1 = scmp.lt.u32.totalorder %s3835_s16, %s3978_s1 }
   0x5   :  { %p3841_p2 = pnand %p3839_p1, %p3836_p0 }
   0x7   :  { %3844 = shalt.err (!%p3841_p2)
}
   0x8   :  { %s3845_s21 = scalar_lea.vmem %s18_s13, 32768  ;;  %p3850_p4 = scmp.lt.s32.totalorder %s18_s13, %s18_s13 }
   0x9   :  { %p3846_p3 = scmp.ne.s32.totalorder %s18_s13, %s3845_s21  ;;  %p3851_p5 = scmp.lt.s32.totalorder %s3845_s21, %s3845_s21 }
   0xb   :  { %p3852_p6 = por %p3851_p5, %p3850_p4 }
   0xd   :  { %p3853_p7 = pnand %p3852_p6, %p3846_p3 }
   0xf   :  { %3856 = shalt.err (!%p3853_p7)
}
  0x10   :  { %s3884_s22 = smov 64   ;;  %s3885_s23 = smov 4  }
  0x11   :  { %23 = dma.hbm_to_vmem [thread:$0]  %s3978_s1, 32768, %s18_s13, [#allocation3], %s3884_s22, %s3884_s22, %s3885_s23  }
  0x12   :  { %3879 = dma.done.wait [#allocation3], 32768  }
  0x13   :  { %3880 = vsyncadd [#allocation3], 4294934528  ;;  %v3571_v0 = vld [vmem:[#allocation2 + $0x40] sm:$0xff]   ;;  %v3575_v4 = vld [vmem:[#allocation2 + $0x48] sm:$0xff]   ;;  %v3886_v22 = vmov 1983009808   ;;  %v50_v24 = vlaneseq }
  0x14   :  { %v3572_v1 = vld [vmem:[#allocation2 + $0xc0] sm:$0xff]   ;;  %3214 = vmatprep.subr.bf16.mxu0 %v3571_v0  ;;  %v3576_v5 = vld [vmem:[#allocation2 + $0xc8] sm:$0xff]   ;;  %v3579_v8 = vld [vmem:[#allocation2 + $0x50] sm:$0xff]   ;;  %v48_v23 = vunpack.c.l.s4 %v3886_v22 }
  0x15   :  { %v3573_v2 = vld [vmem:[#allocation2] sm:$0xff]   ;;  %3236 = vmatprep.subr.bf16.mxu1 %v3572_v1  ;;  %v3577_v6 = vld [vmem:[#allocation2 + $0x8] sm:$0xff]   ;;  %v3580_v9 = vld [vmem:[#allocation2 + $0xd0] sm:$0xff]   ;;  %v51_v30 = vshrl.u32 %v50_v24, 7 }
  0x16   :  { %v3574_v3 = vld [vmem:[#allocation2 + $0x80] sm:$0xff]   ;;  %3215 = vmatpush3.bf16.msra.mxu0 %v3573_v2  ;;  %v3578_v7 = vld [vmem:[#allocation2 + $0x88] sm:$0xff]   ;;  %v3581_v10 = vld [vmem:[#allocation2 + $0x10] sm:$0xff]   ;;  %v49_v29 = vunpack.c.0.s8 %v48_v23 }
  0x17   :  { %3237 = vmatpush3.bf16.msra.mxu1 %v3574_v3  ;;  %3216 = vmatprep.subr.bf16.mxu0 %v3575_v4  ;;  %v3582_v11 = vld [vmem:[#allocation2 + $0x90] sm:$0xff]   ;;  %v3583_v12 = vld [vmem:[#allocation2 + $0x58] sm:$0xff]   ;;  %v3587_v16 = vld [vmem:[#allocation2 + $0x60] sm:$0xff]  }
  0x18   :  { %3238 = vmatprep.subr.bf16.mxu1 %v3576_v5  ;;  %v3584_v13 = vld [vmem:[#allocation2 + $0xd8] sm:$0xff]   ;;  %v3588_v17 = vld [vmem:[#allocation2 + $0xe0] sm:$0xff]   ;;  %v3591_v20 = vld [vmem:[#allocation2 + $0x68] sm:$0xff]   ;;  %v3920_v35 = vsub.s32 %v49_v29, %v51_v30 }
  0x19   :  { %v3585_v14 = vld [vmem:[#allocation2 + $0x18] sm:$0xff]   ;;  %v3589_v18 = vld [vmem:[#allocation2 + $0x20] sm:$0xff]   ;;  %v3592_v21 = vld [vmem:[#allocation2 + $0xe8] sm:$0xff]  }
  0x1a   :  { %3217 = vmatpush3.bf16.msra.mxu0 %v3577_v6  ;;  %v3586_v15 = vld [vmem:[#allocation2 + $0x98] sm:$0xff]   ;;  %v3590_v19 = vld [vmem:[#allocation2 + $0xa0] sm:$0xff]   ;;  %v3593_v25 = vld [vmem:[#allocation2 + $0x28] sm:$0xff]  }
  0x1b   :  { %3239 = vmatpush3.bf16.msra.mxu1 %v3578_v7  ;;  %3218 = vmatprep.subr.bf16.mxu0 %v3579_v8  ;;  %v3594_v26 = vld [vmem:[#allocation2 + $0xa8] sm:$0xff]   ;;  %v3595_v27 = vld [vmem:[#allocation2 + $0x70] sm:$0xff]   ;;  %v3599_v33 = vld [vmem:[#allocation2 + $0x78] sm:$0xff]  }
  0x1c   :  { %3240 = vmatprep.subr.bf16.mxu1 %v3580_v9  ;;  %v3596_v28 = vld [vmem:[#allocation2 + $0xf0] sm:$0xff]   ;;  %v3600_v34 = vld [vmem:[#allocation2 + $0xf8] sm:$0xff]   ;;  %v30_v38 = vld [vmem:[%s3977_s0] sm:$0xff] }
  0x1d   :  { %v3597_v31 = vld [vmem:[#allocation2 + $0x30] sm:$0xff]   ;;  %v3601_v36 = vld [vmem:[#allocation2 + $0x38] sm:$0xff]   ;;  %v53_v39 = vrot.slane %v30_v38, %v3920_v35  ;;  %v46_v40 = vcombine.high %v30_v38, %v30_v38  ;;  %v3604_v41 = vld [vmem:[#allocation2 + $0x140] sm:$0xff]  }
  0x1e   :  { %3219 = vmatpush3.bf16.msra.mxu0 %v3581_v10  ;;  %v3598_v32 = vld [vmem:[#allocation2 + $0xb0] sm:$0xff]   ;;  %v3602_v37 = vld [vmem:[#allocation2 + $0xb8] sm:$0xff]   ;;  %v3605_v42 = vld [vmem:[#allocation2 + $0x1c0] sm:$0xff]  }
  0x1f   :  { %3241 = vmatpush3.bf16.msra.mxu1 %v3582_v11  ;;  %3220 = vmatprep.subr.bf16.mxu0 %v3583_v12  ;;  %v61_v43 = vcombine.high %v53_v39, %v53_v39  ;;  %v60_v44 = vrot.slane %v46_v40, %v3920_v35  ;;  %v214_v45 = vpack.c.bf16 %v53_v39, %v53_v39  ;;  %v3606_v46 = vld [vmem:[#allocation2 + $0x100] sm:$0xff]   ;;  %v3608_v51 = vld [vmem:[#allocation2 + $0x148] sm:$0xff]   ;;  %v3612_v56 = vld [vmem:[#allocation2 + $0x150] sm:$0xff]  }
  0x20   :  { %3242 = vmatprep.subr.bf16.mxu1 %v3584_v13  ;;  %v3607_v49 = vld [vmem:[#allocation2 + $0x180] sm:$0xff]   ;;  %v3609_v53 = vld [vmem:[#allocation2 + $0x1c8] sm:$0xff]   ;;  %v3613_v57 = vld [vmem:[#allocation2 + $0x1d0] sm:$0xff]  }
  0x21   :  { %v215_v47 = vpack.c.bf16 %v61_v43, %v61_v43  ;;  %v62_v48 = vcombine.high %v60_v44, %v60_v44  ;;  %v216_v50 = vpack.c.bf16 %v60_v44, %v60_v44  ;;  %v3610_v54 = vld [vmem:[#allocation2 + $0x108] sm:$0xff]   ;;  %v3614_v58 = vld [vmem:[#allocation2 + $0x110] sm:$0xff]   ;;  %v3616_v60 = vld [vmem:[#allocation2 + $0x158] sm:$0xff]  }
  0x22   :  { %3221 = vmatpush3.bf16.msra.mxu0 %v3585_v14  ;;  %v3611_v55 = vld [vmem:[#allocation2 + $0x188] sm:$0xff]   ;;  %v3615_v59 = vld [vmem:[#allocation2 + $0x190] sm:$0xff]   ;;  %v3617_v61 = vld [vmem:[#allocation2 + $0x1d8] sm:$0xff]  }
  0x23   :  { %3243 = vmatpush3.bf16.msra.mxu1 %v3586_v15  ;;  %3222 = vmatprep.subr.bf16.mxu0 %v3587_v16  ;;  %v217_v52 = vpack.c.bf16 %v62_v48, %v62_v48  ;;  %v3618_v62 = vld [vmem:[#allocation2 + $0x118] sm:$0xff]   ;;  %v3620_v0 = vld [vmem:[#allocation2 + $0x160] sm:$0xff]   ;;  %v3624_v4 = vld [vmem:[#allocation2 + $0x168] sm:$0xff]  }
  0x24   :  { %3244 = vmatprep.subr.bf16.mxu1 %v3588_v17  ;;  %2333 = vmatprep.mubr.bf16.mxu0 %v215_v47  ;;  %v3619_v63 = vld [vmem:[#allocation2 + $0x198] sm:$0xff]   ;;  %v3621_v1 = vld [vmem:[#allocation2 + $0x1e0] sm:$0xff]   ;;  %v3625_v5 = vld [vmem:[#allocation2 + $0x1e8] sm:$0xff]  }
  0x25   :  { %2373 = vmatprep.mubr.bf16.mxu1 %v217_v52  ;;  %v3622_v2 = vld [vmem:[#allocation2 + $0x120] sm:$0xff]   ;;  %v3626_v6 = vld [vmem:[#allocation2 + $0x128] sm:$0xff]   ;;  %v3628_v8 = vld [vmem:[#allocation2 + $0x170] sm:$0xff]  }
  0x26   :  { %3223 = vmatpush3.bf16.msra.mxu0 %v3589_v18  ;;  %v3623_v3 = vld [vmem:[#allocation2 + $0x1a0] sm:$0xff]   ;;  %v3627_v7 = vld [vmem:[#allocation2 + $0x1a8] sm:$0xff]   ;;  %v3629_v9 = vld [vmem:[#allocation2 + $0x1f0] sm:$0xff]  }
  0x27   :  { %3245 = vmatpush3.bf16.msra.mxu1 %v3590_v19  ;;  %3224 = vmatprep.subr.bf16.mxu0 %v3591_v20  ;;  %v3630_v10 = vld [vmem:[#allocation2 + $0x130] sm:$0xff]   ;;  %v3632_v12 = vld [vmem:[#allocation2 + $0x178] sm:$0xff]   ;;  %v31_v15 = vld [vmem:[%s3977_s0 + $0x8] sm:$0xff] }
  0x28   :  { %3246 = vmatprep.subr.bf16.mxu1 %v3592_v21  ;;  %v3631_v11 = vld [vmem:[#allocation2 + $0x1b0] sm:$0xff]   ;;  %v3633_v13 = vld [vmem:[#allocation2 + $0x1f8] sm:$0xff]   ;;  %v70_v17 = vrot.slane %v31_v15, %v3920_v35  ;;  %v63_v18 = vcombine.high %v31_v15, %v31_v15  ;;  %v3637_v19 = vld [vmem:[#allocation2 + $0x240] sm:$0xff]  }
  0x29   :  { %v3634_v14 = vld [vmem:[#allocation2 + $0x138] sm:$0xff]   ;;  %v3638_v22 = vld [vmem:[#allocation2 + $0x2c0] sm:$0xff]   ;;  %v3641_v29 = vld [vmem:[#allocation2 + $0x248] sm:$0xff]  }
  0x2a   :  { %3225 = vmatpush3.bf16.msra.mxu0 %v3593_v25  ;;  %v3635_v16 = vld [vmem:[#allocation2 + $0x1b8] sm:$0xff]   ;;  %v78_v20 = vcombine.high %v70_v17, %v70_v17  ;;  %v77_v21 = vrot.slane %v63_v18, %v3920_v35  ;;  %v218_v23 = vpack.c.bf16 %v70_v17, %v70_v17  ;;  %v3639_v24 = vld [vmem:[#allocation2 + $0x200] sm:$0xff]   ;;  %v3648_v38 = vld [vmem:[#allocation2 + $0x290] sm:$0xff]  }
  0x2b   :  { %3247 = vmatpush3.bf16.msra.mxu1 %v3594_v26  ;;  %3226 = vmatprep.subr.bf16.mxu0 %v3595_v27  ;;  %v3640_v27 = vld [vmem:[#allocation2 + $0x280] sm:$0xff]   ;;  %v3649_v39 = vld [vmem:[#allocation2 + $0x258] sm:$0xff]   ;;  %v3657_v47 = vld [vmem:[#allocation2 + $0x268] sm:$0xff]  }
  0x2c   :  { %3248 = vmatprep.subr.bf16.mxu1 %v3596_v28  ;;  %v219_v25 = vpack.c.bf16 %v78_v20, %v78_v20  ;;  %v79_v26 = vcombine.high %v77_v21, %v77_v21  ;;  %v220_v28 = vpack.c.bf16 %v77_v21, %v77_v21  ;;  %v3650_v40 = vld [vmem:[#allocation2 + $0x2d8] sm:$0xff]   ;;  %v3653_v43 = vld [vmem:[#allocation2 + $0x260] sm:$0xff]   ;;  %v3658_v48 = vld [vmem:[#allocation2 + $0x2e8] sm:$0xff]  }
  0x2d   :  { %v3654_v44 = vld [vmem:[#allocation2 + $0x2e0] sm:$0xff]   ;;  %v3662_v52 = vld [vmem:[#allocation2 + $0x2f0] sm:$0xff]   ;;  %v3682_v17 = vld [vmem:[#allocation2 + $0x358] sm:$0xff]  }
  0x2e   :  { %3227 = vmatpush3.bf16.msra.mxu0 %v3597_v31  ;;  %v221_v30 = vpack.c.bf16 %v79_v26, %v79_v26  ;;  %v3642_v31 = vld [vmem:[#allocation2 + $0x2c8] sm:$0xff]   ;;  %v3680_v15 = vld [vmem:[#allocation2 + $0x310] sm:$0xff]   ;;  %v3683_v18 = vld [vmem:[#allocation2 + $0x3d8] sm:$0xff]  }
  0x2f   :  { %3249 = vmatpush3.bf16.msra.mxu1 %v3598_v32  ;;  %3228 = vmatprep.subr.bf16.mxu0 %v3599_v33  ;;  %v3643_v32 = vld [vmem:[#allocation2 + $0x208] sm:$0xff]   ;;  %v3685_v20 = vld [vmem:[#allocation2 + $0x398] sm:$0xff]   ;;  %v3686_v21 = vld [vmem:[#allocation2 + $0x360] sm:$0xff]  }
  0x30   :  { %3250 = vmatprep.subr.bf16.mxu1 %v3600_v34  ;;  %v3644_v33 = vld [vmem:[#allocation2 + $0x288] sm:$0xff]   ;;  %v3645_v34 = vld [vmem:[#allocation2 + $0x250] sm:$0xff]  }
  0x31   :  { %v3691_v26 = vld [vmem:[#allocation2 + $0x3e8] sm:$0xff]  }
  0x32   :  { %3229 = vmatpush3.bf16.msra.mxu0 %v3601_v36  ;;  %v3646_v36 = vld [vmem:[#allocation2 + $0x2d0] sm:$0xff]  }
  0x33   :  { %3251 = vmatpush3.bf16.msra.mxu1 %v3602_v37  ;;  %3258 = vmatprep.subr.bf16.mxu0 %v3604_v41  ;;  %v3647_v37 = vld [vmem:[#allocation2 + $0x210] sm:$0xff]   ;;  %v3651_v41 = vld [vmem:[#allocation2 + $0x218] sm:$0xff]  }
  0x34   :  { %3280 = vmatprep.subr.bf16.mxu1 %v3605_v42  ;;  %v3652_v42 = vld [vmem:[#allocation2 + $0x298] sm:$0xff]  }
  0x35   :  { %2334 = vmatmul.mubr.bf16.vlgmr.msra.gmra.mrb[0].mxu0 %v214_v45  ;;  %v3655_v45 = vld [vmem:[#allocation2 + $0x220] sm:$0xff]  }
  0x36   :  { %3259 = vmatpush3.bf16.msra.mxu0 %v3606_v46  ;;  %2374 = vmatmul.mubr.bf16.vlgmr.msra.gmra.mrb[0].mxu1 %v216_v50  ;;  %v3656_v46 = vld [vmem:[#allocation2 + $0x2a0] sm:$0xff]   ;;  %v3660_v50 = vld [vmem:[#allocation2 + $0x2a8] sm:$0xff]  }
  0x37   :  { %3260 = vmatprep.subr.bf16.mxu0 %v3608_v51  ;;  %3281 = vmatpush3.bf16.msra.mxu1 %v3607_v49  ;;  %v3659_v49 = vld [vmem:[#allocation2 + $0x228] sm:$0xff]   ;;  %v3661_v51 = vld [vmem:[#allocation2 + $0x270] sm:$0xff]  }
  0x38   :  { %3282 = vmatprep.subr.bf16.mxu1 %v3609_v53  ;;  %2413 = vmatprep.mubr.bf16.mxu0 %v219_v25  ;;  %v3663_v53 = vld [vmem:[#allocation2 + $0x230] sm:$0xff]   ;;  %v3690_v25 = vld [vmem:[#allocation2 + $0x368] sm:$0xff]  }
  0x39   :  { %2453 = vmatprep.mubr.bf16.mxu1 %v221_v30  ;;  %v3695_v30 = vld [vmem:[#allocation2 + $0x3f0] sm:$0xff]  }
  0x3a   :  { %3261 = vmatpush3.bf16.msra.mxu0 %v3610_v54  ;;  %v3664_v54 = vld [vmem:[#allocation2 + $0x2b0] sm:$0xff]  }
  0x3b   :  { %3262 = vmatprep.subr.bf16.mxu0 %v3612_v56  ;;  %3283 = vmatpush3.bf16.msra.mxu1 %v3611_v55  ;;  %v3665_v55 = vld [vmem:[#allocation2 + $0x278] sm:$0xff]  }
  0x3c   :  { %3284 = vmatprep.subr.bf16.mxu1 %v3613_v57  ;;  %v3666_v56 = vld [vmem:[#allocation2 + $0x2f8] sm:$0xff]  }
  0x3d   :  { %v3667_v57 = vld [vmem:[#allocation2 + $0x238] sm:$0xff]  }
  0x3e   :  { %3263 = vmatpush3.bf16.msra.mxu0 %v3614_v58  ;;  %v32_v58 = vld [vmem:[%s3977_s0 + $0x10] sm:$0xff] }
  0x3f   :  { %3264 = vmatprep.subr.bf16.mxu0 %v3616_v60  ;;  %3285 = vmatpush3.bf16.msra.mxu1 %v3615_v59  ;;  %v3668_v59 = vld [vmem:[#allocation2 + $0x2b8] sm:$0xff]   ;;  %v87_v60 = vrot.slane %v32_v58, %v3920_v35 }
  0x40   :  { %3286 = vmatprep.subr.bf16.mxu1 %v3617_v61  ;;  %v80_v61 = vcombine.high %v32_v58, %v32_v58  ;;  %v3713_v58 = vld [vmem:[#allocation2 + $0x410] sm:$0xff]  }
  0x42   :  { %3265 = vmatpush3.bf16.msra.mxu0 %v3618_v62  ;;  %v3670_v62 = vld [vmem:[#allocation2 + $0x340] sm:$0xff]  }
  0x43   :  { %3266 = vmatprep.subr.bf16.mxu0 %v3620_v0  ;;  %3287 = vmatpush3.bf16.msra.mxu1 %v3619_v63  ;;  %v95_v63 = vcombine.high %v87_v60, %v87_v60  ;;  %v94_v0 = vrot.slane %v80_v61, %v3920_v35  ;;  %v3716_v61 = vld [vmem:[#allocation2 + $0x4d8] sm:$0xff]  }
  0x44   :  { %3288 = vmatprep.subr.bf16.mxu1 %v3621_v1  ;;  %v3671_v1 = vld [vmem:[#allocation2 + $0x3c0] sm:$0xff]  }
  0x46   :  { %3267 = vmatpush3.bf16.msra.mxu0 %v3622_v2  ;;  %v222_v2 = vpack.c.bf16 %v87_v60, %v87_v60  ;;  %v3715_v60 = vld [vmem:[#allocation2 + $0x458] sm:$0xff]  }
  0x47   :  { %3268 = vmatprep.subr.bf16.mxu0 %v3624_v4  ;;  %3289 = vmatpush3.bf16.msra.mxu1 %v3623_v3  ;;  %v3672_v3 = vld [vmem:[#allocation2 + $0x300] sm:$0xff]   ;;  %v223_v4 = vpack.c.bf16 %v95_v63, %v95_v63  ;;  %v3718_v63 = vld [vmem:[#allocation2 + $0x498] sm:$0xff]  }
  0x48   :  { %3290 = vmatprep.subr.bf16.mxu1 %v3625_v5  ;;  %v96_v5 = vcombine.high %v94_v0, %v94_v0 }
  0x4a   :  { %3269 = vmatpush3.bf16.msra.mxu0 %v3626_v6  ;;  %v3673_v6 = vld [vmem:[#allocation2 + $0x380] sm:$0xff]  }
  0x4b   :  { %3270 = vmatprep.subr.bf16.mxu0 %v3628_v8  ;;  %3291 = vmatpush3.bf16.msra.mxu1 %v3627_v7  ;;  %v224_v7 = vpack.c.bf16 %v94_v0, %v94_v0  ;;  %v3674_v8 = vld [vmem:[#allocation2 + $0x348] sm:$0xff]   ;;  %v3719_v0 = vld [vmem:[#allocation2 + $0x460] sm:$0xff]  }
  0x4c   :  { %3292 = vmatprep.subr.bf16.mxu1 %v3629_v9  ;;  %v225_v9 = vpack.c.bf16 %v96_v5, %v96_v5  ;;  %v3724_v5 = vld [vmem:[#allocation2 + $0x4e8] sm:$0xff]  }
  0x4e   :  { %3271 = vmatpush3.bf16.msra.mxu0 %v3630_v10  ;;  %v3675_v10 = vld [vmem:[#allocation2 + $0x3c8] sm:$0xff]  }
  0x4f   :  { %3272 = vmatprep.subr.bf16.mxu0 %v3632_v12  ;;  %3293 = vmatpush3.bf16.msra.mxu1 %v3631_v11  ;;  %v3676_v11 = vld [vmem:[#allocation2 + $0x308] sm:$0xff]  }
  0x50   :  { %3294 = vmatprep.subr.bf16.mxu1 %v3633_v13  ;;  %v3677_v12 = vld [vmem:[#allocation2 + $0x388] sm:$0xff]   ;;  %v3678_v13 = vld [vmem:[#allocation2 + $0x350] sm:$0xff]  }
  0x52   :  { %3273 = vmatpush3.bf16.msra.mxu0 %v3634_v14  ;;  %v3679_v14 = vld [vmem:[#allocation2 + $0x3d0] sm:$0xff]  }
  0x53   :  { %3302 = vmatprep.subr.bf16.mxu0 %v3637_v19  ;;  %3295 = vmatpush3.bf16.msra.mxu1 %v3635_v16  ;;  %v3681_v16 = vld [vmem:[#allocation2 + $0x390] sm:$0xff]   ;;  %v3684_v19 = vld [vmem:[#allocation2 + $0x318] sm:$0xff]  }
  0x54   :  { %3324 = vmatprep.subr.bf16.mxu1 %v3638_v22  ;;  %v3687_v22 = vld [vmem:[#allocation2 + $0x3e0] sm:$0xff]  }
  0x55   :  { %2414 = vmatmul.mubr.bf16.vlgmr.msra.gmra.mrb[4].mxu0 %v218_v23  ;;  %v3688_v23 = vld [vmem:[#allocation2 + $0x320] sm:$0xff]  }
  0x56   :  { %3303 = vmatpush3.bf16.msra.mxu0 %v3639_v24  ;;  %2454 = vmatmul.mubr.bf16.vlgmr.msra.gmra.mrb[4].mxu1 %v220_v28  ;;  %v3689_v24 = vld [vmem:[#allocation2 + $0x3a0] sm:$0xff]   ;;  %v3693_v28 = vld [vmem:[#allocation2 + $0x3a8] sm:$0xff]  }
  0x57   :  { %3304 = vmatprep.subr.bf16.mxu0 %v3641_v29  ;;  %3325 = vmatpush3.bf16.msra.mxu1 %v3640_v27  ;;  %v3692_v27 = vld [vmem:[#allocation2 + $0x328] sm:$0xff]   ;;  %v3694_v29 = vld [vmem:[#allocation2 + $0x370] sm:$0xff]  }
  0x58   :  { %3326 = vmatprep.subr.bf16.mxu1 %v3642_v31  ;;  %2493 = vmatprep.mubr.bf16.mxu0 %v223_v4  ;;  %v3696_v31 = vld [vmem:[#allocation2 + $0x330] sm:$0xff]   ;;  %v3723_v4 = vld [vmem:[#allocation2 + $0x468] sm:$0xff]  }
  0x59   :  { %2533 = vmatprep.mubr.bf16.mxu1 %v225_v9  ;;  %v3728_v9 = vld [vmem:[#allocation2 + $0x4f0] sm:$0xff]  }
  0x5a   :  { %3305 = vmatpush3.bf16.msra.mxu0 %v3643_v32  ;;  %v3697_v32 = vld [vmem:[#allocation2 + $0x3b0] sm:$0xff]  }
  0x5b   :  { %3306 = vmatprep.subr.bf16.mxu0 %v3645_v34  ;;  %3327 = vmatpush3.bf16.msra.mxu1 %v3644_v33  ;;  %v3698_v33 = vld [vmem:[#allocation2 + $0x378] sm:$0xff]  }
  0x5c   :  { %3328 = vmatprep.subr.bf16.mxu1 %v3646_v36  ;;  %v3699_v34 = vld [vmem:[#allocation2 + $0x3f8] sm:$0xff]  }
  0x5d   :  { %v3700_v36 = vld [vmem:[#allocation2 + $0x338] sm:$0xff]  }
  0x5e   :  { %3307 = vmatpush3.bf16.msra.mxu0 %v3647_v37  ;;  %v33_v37 = vld [vmem:[%s3977_s0 + $0x18] sm:$0xff] }
  0x5f   :  { %3308 = vmatprep.subr.bf16.mxu0 %v3649_v39  ;;  %3329 = vmatpush3.bf16.msra.mxu1 %v3648_v38  ;;  %v104_v38 = vrot.slane %v33_v37, %v3920_v35  ;;  %v97_v39 = vcombine.high %v33_v37, %v33_v37  ;;  %v3746_v37 = vld [vmem:[#allocation2 + $0x510] sm:$0xff]  }
  0x60   :  { %3330 = vmatprep.subr.bf16.mxu1 %v3650_v40  ;;  %v3703_v40 = vld [vmem:[#allocation2 + $0x440] sm:$0xff]  }
  0x62   :  { %3309 = vmatpush3.bf16.msra.mxu0 %v3651_v41  ;;  %v3701_v41 = vld [vmem:[#allocation2 + $0x3b8] sm:$0xff]  }
  0x63   :  { %3310 = vmatprep.subr.bf16.mxu0 %v3653_v43  ;;  %3331 = vmatpush3.bf16.msra.mxu1 %v3652_v42  ;;  %v112_v42 = vcombine.high %v104_v38, %v104_v38  ;;  %v111_v43 = vrot.slane %v97_v39, %v3920_v35  ;;  %v3748_v39 = vld [vmem:[#allocation2 + $0x558] sm:$0xff]  }
  0x64   :  { %3332 = vmatprep.subr.bf16.mxu1 %v3654_v44  ;;  %v3704_v44 = vld [vmem:[#allocation2 + $0x4c0] sm:$0xff]  }
  0x66   :  { %3311 = vmatpush3.bf16.msra.mxu0 %v3655_v45  ;;  %v226_v45 = vpack.c.bf16 %v104_v38, %v104_v38  ;;  %v3747_v38 = vld [vmem:[#allocation2 + $0x590] sm:$0xff]  }
  0x67   :  { %3312 = vmatprep.subr.bf16.mxu0 %v3657_v47  ;;  %3333 = vmatpush3.bf16.msra.mxu1 %v3656_v46  ;;  %v3705_v46 = vld [vmem:[#allocation2 + $0x400] sm:$0xff]   ;;  %v227_v47 = vpack.c.bf16 %v112_v42, %v112_v42  ;;  %v3751_v42 = vld [vmem:[#allocation2 + $0x598] sm:$0xff]  }
  0x68   :  { %3334 = vmatprep.subr.bf16.mxu1 %v3658_v48  ;;  %v113_v48 = vcombine.high %v111_v43, %v111_v43 }
  0x6a   :  { %3313 = vmatpush3.bf16.msra.mxu0 %v3659_v49  ;;  %v3706_v49 = vld [vmem:[#allocation2 + $0x480] sm:$0xff]  }
  0x6b   :  { %3314 = vmatprep.subr.bf16.mxu0 %v3661_v51  ;;  %3335 = vmatpush3.bf16.msra.mxu1 %v3660_v50  ;;  %v228_v50 = vpack.c.bf16 %v111_v43, %v111_v43  ;;  %v3707_v51 = vld [vmem:[#allocation2 + $0x448] sm:$0xff]   ;;  %v3752_v43 = vld [vmem:[#allocation2 + $0x560] sm:$0xff]  }
  0x6c   :  { %3336 = vmatprep.subr.bf16.mxu1 %v3662_v52  ;;  %v229_v52 = vpack.c.bf16 %v113_v48, %v113_v48  ;;  %v3757_v48 = vld [vmem:[#allocation2 + $0x5e8] sm:$0xff]  }
  0x6e   :  { %3315 = vmatpush3.bf16.msra.mxu0 %v3663_v53  ;;  %v3708_v53 = vld [vmem:[#allocation2 + $0x4c8] sm:$0xff]  }
  0x6f   :  { %3316 = vmatprep.subr.bf16.mxu0 %v3665_v55  ;;  %3337 = vmatpush3.bf16.msra.mxu1 %v3664_v54  ;;  %v3709_v54 = vld [vmem:[#allocation2 + $0x408] sm:$0xff]  }
  0x70   :  { %3338 = vmatprep.subr.bf16.mxu1 %v3666_v56  ;;  %v3710_v55 = vld [vmem:[#allocation2 + $0x488] sm:$0xff]   ;;  %v3711_v56 = vld [vmem:[#allocation2 + $0x450] sm:$0xff]  }
  0x72   :  { %3317 = vmatpush3.bf16.msra.mxu0 %v3667_v57  ;;  %v3712_v57 = vld [vmem:[#allocation2 + $0x4d0] sm:$0xff]  }
  0x73   :  { %3346 = vmatprep.subr.bf16.mxu0 %v3670_v62  ;;  %3339 = vmatpush3.bf16.msra.mxu1 %v3668_v59  ;;  %v3714_v59 = vld [vmem:[#allocation2 + $0x490] sm:$0xff]   ;;  %v3717_v62 = vld [vmem:[#allocation2 + $0x418] sm:$0xff]  }
  0x74   :  { %3368 = vmatprep.subr.bf16.mxu1 %v3671_v1  ;;  %v3720_v1 = vld [vmem:[#allocation2 + $0x4e0] sm:$0xff]  }
  0x75   :  { %2494 = vmatmul.mubr.bf16.vlgmr.msra.gmra.mrb[8].mxu0 %v222_v2  ;;  %v3721_v2 = vld [vmem:[#allocation2 + $0x420] sm:$0xff]  }
  0x76   :  { %3347 = vmatpush3.bf16.msra.mxu0 %v3672_v3  ;;  %2534 = vmatmul.mubr.bf16.vlgmr.msra.gmra.mrb[8].mxu1 %v224_v7  ;;  %v3722_v3 = vld [vmem:[#allocation2 + $0x4a0] sm:$0xff]   ;;  %v3726_v7 = vld [vmem:[#allocation2 + $0x4a8] sm:$0xff]  }
  0x77   :  { %3348 = vmatprep.subr.bf16.mxu0 %v3674_v8  ;;  %3369 = vmatpush3.bf16.msra.mxu1 %v3673_v6  ;;  %v3725_v6 = vld [vmem:[#allocation2 + $0x428] sm:$0xff]   ;;  %v3727_v8 = vld [vmem:[#allocation2 + $0x470] sm:$0xff]  }
  0x78   :  { %3370 = vmatprep.subr.bf16.mxu1 %v3675_v10  ;;  %2573 = vmatprep.mubr.bf16.mxu0 %v227_v47  ;;  %v3729_v10 = vld [vmem:[#allocation2 + $0x430] sm:$0xff]   ;;  %v3756_v47 = vld [vmem:[#allocation2 + $0x568] sm:$0xff]  }
  0x79   :  { %2613 = vmatprep.mubr.bf16.mxu1 %v229_v52  ;;  %v3761_v52 = vld [vmem:[#allocation2 + $0x5f0] sm:$0xff]  }
  0x7a   :  { %3349 = vmatpush3.bf16.msra.mxu0 %v3676_v11  ;;  %v3730_v11 = vld [vmem:[#allocation2 + $0x4b0] sm:$0xff]  }
  0x7b   :  { %3350 = vmatprep.subr.bf16.mxu0 %v3678_v13  ;;  %3371 = vmatpush3.bf16.msra.mxu1 %v3677_v12  ;;  %v3731_v12 = vld [vmem:[#allocation2 + $0x478] sm:$0xff]  }
  0x7c   :  { %3372 = vmatprep.subr.bf16.mxu1 %v3679_v14  ;;  %v3732_v13 = vld [vmem:[#allocation2 + $0x4f8] sm:$0xff]  }
  0x7d   :  { %v3733_v14 = vld [vmem:[#allocation2 + $0x438] sm:$0xff]  }
  0x7e   :  { %3351 = vmatpush3.bf16.msra.mxu0 %v3680_v15  ;;  %v34_v15 = vld [vmem:[%s3977_s0 + $0x20] sm:$0xff] }
  0x7f   :  { %3352 = vmatprep.subr.bf16.mxu0 %v3682_v17  ;;  %3373 = vmatpush3.bf16.msra.mxu1 %v3681_v16  ;;  %v3734_v16 = vld [vmem:[#allocation2 + $0x4b8] sm:$0xff]   ;;  %v121_v17 = vrot.slane %v34_v15, %v3920_v35 }
  0x80   :  { %3374 = vmatprep.subr.bf16.mxu1 %v3683_v18  ;;  %v114_v18 = vcombine.high %v34_v15, %v34_v15  ;;  %v3779_v15 = vld [vmem:[#allocation2 + $0x610] sm:$0xff]  }
  0x82   :  { %3353 = vmatpush3.bf16.msra.mxu0 %v3684_v19  ;;  %v3736_v19 = vld [vmem:[#allocation2 + $0x540] sm:$0xff]  }
  0x83   :  { %3354 = vmatprep.subr.bf16.mxu0 %v3686_v21  ;;  %3375 = vmatpush3.bf16.msra.mxu1 %v3685_v20  ;;  %v129_v20 = vcombine.high %v121_v17, %v121_v17  ;;  %v128_v21 = vrot.slane %v114_v18, %v3920_v35  ;;  %v3782_v18 = vld [vmem:[#allocation2 + $0x6d8] sm:$0xff]  }
  0x84   :  { %3376 = vmatprep.subr.bf16.mxu1 %v3687_v22  ;;  %v3737_v22 = vld [vmem:[#allocation2 + $0x5c0] sm:$0xff]  }
  0x86   :  { %3355 = vmatpush3.bf16.msra.mxu0 %v3688_v23  ;;  %v230_v23 = vpack.c.bf16 %v121_v17, %v121_v17  ;;  %v3781_v17 = vld [vmem:[#allocation2 + $0x658] sm:$0xff]  }
  0x87   :  { %3356 = vmatprep.subr.bf16.mxu0 %v3690_v25  ;;  %3377 = vmatpush3.bf16.msra.mxu1 %v3689_v24  ;;  %v3738_v24 = vld [vmem:[#allocation2 + $0x500] sm:$0xff]   ;;  %v231_v25 = vpack.c.bf16 %v129_v20, %v129_v20  ;;  %v3784_v20 = vld [vmem:[#allocation2 + $0x698] sm:$0xff]  }
  0x88   :  { %3378 = vmatprep.subr.bf16.mxu1 %v3691_v26  ;;  %v130_v26 = vcombine.high %v128_v21, %v128_v21 }
  0x8a   :  { %3357 = vmatpush3.bf16.msra.mxu0 %v3692_v27  ;;  %v3739_v27 = vld [vmem:[#allocation2 + $0x580] sm:$0xff]  }
  0x8b   :  { %3358 = vmatprep.subr.bf16.mxu0 %v3694_v29  ;;  %3379 = vmatpush3.bf16.msra.mxu1 %v3693_v28  ;;  %v232_v28 = vpack.c.bf16 %v128_v21, %v128_v21  ;;  %v3740_v29 = vld [vmem:[#allocation2 + $0x548] sm:$0xff]   ;;  %v3785_v21 = vld [vmem:[#allocation2 + $0x660] sm:$0xff]  }
  0x8c   :  { %3380 = vmatprep.subr.bf16.mxu1 %v3695_v30  ;;  %v233_v30 = vpack.c.bf16 %v130_v26, %v130_v26  ;;  %v3790_v26 = vld [vmem:[#allocation2 + $0x6e8] sm:$0xff]  }
  0x8e   :  { %3359 = vmatpush3.bf16.msra.mxu0 %v3696_v31  ;;  %v3741_v31 = vld [vmem:[#allocation2 + $0x5c8] sm:$0xff]  }
  0x8f   :  { %3360 = vmatprep.subr.bf16.mxu0 %v3698_v33  ;;  %3381 = vmatpush3.bf16.msra.mxu1 %v3697_v32  ;;  %v3742_v32 = vld [vmem:[#allocation2 + $0x508] sm:$0xff]  }
  0x90   :  { %3382 = vmatprep.subr.bf16.mxu1 %v3699_v34  ;;  %v3743_v33 = vld [vmem:[#allocation2 + $0x588] sm:$0xff]   ;;  %v3744_v34 = vld [vmem:[#allocation2 + $0x550] sm:$0xff]  }
  0x92   :  { %3361 = vmatpush3.bf16.msra.mxu0 %v3700_v36  ;;  %v3745_v36 = vld [vmem:[#allocation2 + $0x5d0] sm:$0xff]  }
  0x93   :  { %3390 = vmatprep.subr.bf16.mxu0 %v3703_v40  ;;  %3383 = vmatpush3.bf16.msra.mxu1 %v3701_v41  ;;  %v3749_v40 = vld [vmem:[#allocation2 + $0x5d8] sm:$0xff]  }
  0x94   :  { %3412 = vmatprep.subr.bf16.mxu1 %v3704_v44  ;;  %v3750_v41 = vld [vmem:[#allocation2 + $0x518] sm:$0xff]   ;;  %v3753_v44 = vld [vmem:[#allocation2 + $0x5e0] sm:$0xff]  }
  0x95   :  { %2574 = vmatmul.mubr.bf16.vlgmr.msra.gmra.mrb[12].mxu0 %v226_v45  ;;  %v3754_v45 = vld [vmem:[#allocation2 + $0x520] sm:$0xff]  }
  0x96   :  { %3391 = vmatpush3.bf16.msra.mxu0 %v3705_v46  ;;  %2614 = vmatmul.mubr.bf16.vlgmr.msra.gmra.mrb[12].mxu1 %v228_v50  ;;  %v3755_v46 = vld [vmem:[#allocation2 + $0x5a0] sm:$0xff]   ;;  %v3759_v50 = vld [vmem:[#allocation2 + $0x5a8] sm:$0xff]  }
  0x97   :  { %3392 = vmatprep.subr.bf16.mxu0 %v3707_v51  ;;  %3413 = vmatpush3.bf16.msra.mxu1 %v3706_v49  ;;  %v3758_v49 = vld [vmem:[#allocation2 + $0x528] sm:$0xff]   ;;  %v3760_v51 = vld [vmem:[#allocation2 + $0x570] sm:$0xff]  }
  0x98   :  { %3414 = vmatprep.subr.bf16.mxu1 %v3708_v53  ;;  %2653 = vmatprep.mubr.bf16.mxu0 %v231_v25  ;;  %v3762_v53 = vld [vmem:[#allocation2 + $0x530] sm:$0xff]   ;;  %v3789_v25 = vld [vmem:[#allocation2 + $0x668] sm:$0xff]  }
  0x99   :  { %2693 = vmatprep.mubr.bf16.mxu1 %v233_v30  ;;  %v3794_v30 = vld [vmem:[#allocation2 + $0x6f0] sm:$0xff]  }
  0x9a   :  { %3393 = vmatpush3.bf16.msra.mxu0 %v3709_v54  ;;  %v3763_v54 = vld [vmem:[#allocation2 + $0x5b0] sm:$0xff]  }
  0x9b   :  { %3394 = vmatprep.subr.bf16.mxu0 %v3711_v56  ;;  %3415 = vmatpush3.bf16.msra.mxu1 %v3710_v55  ;;  %v3764_v55 = vld [vmem:[#allocation2 + $0x578] sm:$0xff]  }
  0x9c   :  { %3416 = vmatprep.subr.bf16.mxu1 %v3712_v57  ;;  %v3765_v56 = vld [vmem:[#allocation2 + $0x5f8] sm:$0xff]  }
  0x9d   :  { %v3766_v57 = vld [vmem:[#allocation2 + $0x538] sm:$0xff]  }
  0x9e   :  { %3395 = vmatpush3.bf16.msra.mxu0 %v3713_v58  ;;  %v35_v58 = vld [vmem:[%s3977_s0 + $0x28] sm:$0xff] }
  0x9f   :  { %3396 = vmatprep.subr.bf16.mxu0 %v3715_v60  ;;  %3417 = vmatpush3.bf16.msra.mxu1 %v3714_v59  ;;  %v3767_v59 = vld [vmem:[#allocation2 + $0x5b8] sm:$0xff]   ;;  %v138_v60 = vrot.slane %v35_v58, %v3920_v35 }
  0xa0   :  { %3418 = vmatprep.subr.bf16.mxu1 %v3716_v61  ;;  %v131_v61 = vcombine.high %v35_v58, %v35_v58  ;;  %v3812_v58 = vld [vmem:[#allocation2 + $0x710] sm:$0xff]  }
  0xa2   :  { %3397 = vmatpush3.bf16.msra.mxu0 %v3717_v62  ;;  %v3769_v62 = vld [vmem:[#allocation2 + $0x640] sm:$0xff]  }
  0xa3   :  { %3398 = vmatprep.subr.bf16.mxu0 %v3719_v0  ;;  %3419 = vmatpush3.bf16.msra.mxu1 %v3718_v63  ;;  %v146_v63 = vcombine.high %v138_v60, %v138_v60  ;;  %v145_v0 = vrot.slane %v131_v61, %v3920_v35  ;;  %v3815_v61 = vld [vmem:[#allocation2 + $0x7d8] sm:$0xff]  }
  0xa4   :  { %3420 = vmatprep.subr.bf16.mxu1 %v3720_v1  ;;  %v3770_v1 = vld [vmem:[#allocation2 + $0x6c0] sm:$0xff]  }
  0xa6   :  { %3399 = vmatpush3.bf16.msra.mxu0 %v3721_v2  ;;  %v234_v2 = vpack.c.bf16 %v138_v60, %v138_v60  ;;  %v3813_v60 = vld [vmem:[#allocation2 + $0x790] sm:$0xff]  }
  0xa7   :  { %3400 = vmatprep.subr.bf16.mxu0 %v3723_v4  ;;  %3421 = vmatpush3.bf16.msra.mxu1 %v3722_v3  ;;  %v3771_v3 = vld [vmem:[#allocation2 + $0x600] sm:$0xff]   ;;  %v235_v4 = vpack.c.bf16 %v146_v63, %v146_v63 }
  0xa8   :  { %3422 = vmatprep.subr.bf16.mxu1 %v3724_v5  ;;  %v147_v5 = vcombine.high %v145_v0, %v145_v0  ;;  %v3818_v63 = vld [vmem:[#allocation2 + $0x760] sm:$0xff]  }
  0xaa   :  { %3401 = vmatpush3.bf16.msra.mxu0 %v3725_v6  ;;  %v3772_v6 = vld [vmem:[#allocation2 + $0x680] sm:$0xff]  }
  0xab   :  { %3402 = vmatprep.subr.bf16.mxu0 %v3727_v8  ;;  %3423 = vmatpush3.bf16.msra.mxu1 %v3726_v7  ;;  %v236_v7 = vpack.c.bf16 %v145_v0, %v145_v0  ;;  %v3773_v8 = vld [vmem:[#allocation2 + $0x648] sm:$0xff]   ;;  %v3817_v0 = vld [vmem:[#allocation2 + $0x798] sm:$0xff]  }
  0xac   :  { %3424 = vmatprep.subr.bf16.mxu1 %v3728_v9  ;;  %v237_v9 = vpack.c.bf16 %v147_v5, %v147_v5  ;;  %v2957_v5 = vld [vmem:[%s3979_s2] ss:$0 sm:$0xff] }
  0xae   :  { %3403 = vmatpush3.bf16.msra.mxu0 %v3729_v10  ;;  %v3774_v10 = vld [vmem:[#allocation2 + $0x6c8] sm:$0xff]  }
  0xaf   :  { %3404 = vmatprep.subr.bf16.mxu0 %v3731_v12  ;;  %3425 = vmatpush3.bf16.msra.mxu1 %v3730_v11  ;;  %v3775_v11 = vld [vmem:[#allocation2 + $0x608] sm:$0xff]  }
  0xb0   :  { %3426 = vmatprep.subr.bf16.mxu1 %v3732_v13  ;;  %v3776_v12 = vld [vmem:[#allocation2 + $0x688] sm:$0xff]   ;;  %v3777_v13 = vld [vmem:[#allocation2 + $0x650] sm:$0xff]  }
  0xb2   :  { %3405 = vmatpush3.bf16.msra.mxu0 %v3733_v14  ;;  %v3778_v14 = vld [vmem:[#allocation2 + $0x6d0] sm:$0xff]  }
  0xb3   :  { %3434 = vmatprep.subr.bf16.mxu0 %v3736_v19  ;;  %3427 = vmatpush3.bf16.msra.mxu1 %v3734_v16  ;;  %v3780_v16 = vld [vmem:[#allocation2 + $0x690] sm:$0xff]   ;;  %v3783_v19 = vld [vmem:[#allocation2 + $0x618] sm:$0xff]  }
  0xb4   :  { %3456 = vmatprep.subr.bf16.mxu1 %v3737_v22  ;;  %v3786_v22 = vld [vmem:[#allocation2 + $0x6e0] sm:$0xff]  }
  0xb5   :  { %2654 = vmatmul.mubr.bf16.vlgmr.msra.gmra.mrb[16].mxu0 %v230_v23  ;;  %v3787_v23 = vld [vmem:[#allocation2 + $0x620] sm:$0xff]  }
  0xb6   :  { %3435 = vmatpush3.bf16.msra.mxu0 %v3738_v24  ;;  %2694 = vmatmul.mubr.bf16.vlgmr.msra.gmra.mrb[16].mxu1 %v232_v28  ;;  %v3788_v24 = vld [vmem:[#allocation2 + $0x6a0] sm:$0xff]   ;;  %v3792_v28 = vld [vmem:[#allocation2 + $0x6a8] sm:$0xff]  }
  0xb7   :  { %3436 = vmatprep.subr.bf16.mxu0 %v3740_v29  ;;  %3457 = vmatpush3.bf16.msra.mxu1 %v3739_v27  ;;  %v3791_v27 = vld [vmem:[#allocation2 + $0x628] sm:$0xff]   ;;  %v3793_v29 = vld [vmem:[#allocation2 + $0x670] sm:$0xff]  }
  0xb8   :  { %3458 = vmatprep.subr.bf16.mxu1 %v3741_v31  ;;  %2733 = vmatprep.mubr.bf16.mxu0 %v235_v4  ;;  %v3795_v31 = vld [vmem:[#allocation2 + $0x630] sm:$0xff]   ;;  %v3821_v4 = vld [vmem:[#allocation2 + $0x7a0] sm:$0xff]  }
  0xb9   :  { %2773 = vmatprep.mubr.bf16.mxu1 %v237_v9 }
  0xba   :  { %3437 = vmatpush3.bf16.msra.mxu0 %v3742_v32  ;;  %v3796_v32 = vld [vmem:[#allocation2 + $0x6b0] sm:$0xff]  }
  0xbb   :  { %3438 = vmatprep.subr.bf16.mxu0 %v3744_v34  ;;  %3459 = vmatpush3.bf16.msra.mxu1 %v3743_v33  ;;  %v3797_v33 = vld [vmem:[#allocation2 + $0x678] sm:$0xff]  }
  0xbc   :  { %3460 = vmatprep.subr.bf16.mxu1 %v3745_v36  ;;  %v3798_v34 = vld [vmem:[#allocation2 + $0x6f8] sm:$0xff]  }
  0xbd   :  { %v3799_v36 = vld [vmem:[#allocation2 + $0x638] sm:$0xff]  }
  0xbe   :  { %3439 = vmatpush3.bf16.msra.mxu0 %v3746_v37  ;;  %v36_v37 = vld [vmem:[%s3977_s0 + $0x30] sm:$0xff] }
  0xbf   :  { %3440 = vmatprep.subr.bf16.mxu0 %v3748_v39  ;;  %3461 = vmatpush3.bf16.msra.mxu1 %v3747_v38  ;;  %v155_v38 = vrot.slane %v36_v37, %v3920_v35  ;;  %v148_v39 = vcombine.high %v36_v37, %v36_v37 }
  0xc0   :  { %3462 = vmatprep.subr.bf16.mxu1 %v3749_v40  ;;  %v3802_v40 = vld [vmem:[#allocation2 + $0x740] sm:$0xff]  }
  0xc2   :  { %3441 = vmatpush3.bf16.msra.mxu0 %v3750_v41  ;;  %v3800_v41 = vld [vmem:[#allocation2 + $0x6b8] sm:$0xff]  }
  0xc3   :  { %3442 = vmatprep.subr.bf16.mxu0 %v3752_v43  ;;  %3463 = vmatpush3.bf16.msra.mxu1 %v3751_v42  ;;  %v163_v42 = vcombine.high %v155_v38, %v155_v38  ;;  %v162_v43 = vrot.slane %v148_v39, %v3920_v35 }
  0xc4   :  { %3464 = vmatprep.subr.bf16.mxu1 %v3753_v44  ;;  %v3803_v44 = vld [vmem:[#allocation2 + $0x7c0] sm:$0xff]  }
  0xc6   :  { %3443 = vmatpush3.bf16.msra.mxu0 %v3754_v45  ;;  %v238_v45 = vpack.c.bf16 %v155_v38, %v155_v38 }
  0xc7   :  { %3444 = vmatprep.subr.bf16.mxu0 %v3756_v47  ;;  %3465 = vmatpush3.bf16.msra.mxu1 %v3755_v46  ;;  %v239_v46 = vpack.c.bf16 %v163_v42, %v163_v42  ;;  %v164_v47 = vcombine.high %v162_v43, %v162_v43 }
  0xc8   :  { %3466 = vmatprep.subr.bf16.mxu1 %v3757_v48  ;;  %v3804_v48 = vld [vmem:[#allocation2 + $0x700] sm:$0xff]  }
  0xca   :  { %3445 = vmatpush3.bf16.msra.mxu0 %v3758_v49  ;;  %v240_v49 = vpack.c.bf16 %v162_v43, %v162_v43 }
  0xcb   :  { %3446 = vmatprep.subr.bf16.mxu0 %v3760_v51  ;;  %3467 = vmatpush3.bf16.msra.mxu1 %v3759_v50  ;;  %v3806_v50 = vld [vmem:[#allocation2 + $0x748] sm:$0xff]   ;;  %v241_v51 = vpack.c.bf16 %v164_v47, %v164_v47 }
  0xcc   :  { %3468 = vmatprep.subr.bf16.mxu1 %v3761_v52  ;;  %v3805_v52 = vld [vmem:[#allocation2 + $0x780] sm:$0xff]  }
  0xce   :  { %3447 = vmatpush3.bf16.msra.mxu0 %v3762_v53  ;;  %v3807_v53 = vld [vmem:[#allocation2 + $0x7c8] sm:$0xff]  }
  0xcf   :  { %3448 = vmatprep.subr.bf16.mxu0 %v3764_v55  ;;  %3469 = vmatpush3.bf16.msra.mxu1 %v3763_v54  ;;  %v3808_v54 = vld [vmem:[#allocation2 + $0x708] sm:$0xff]   ;;  %v3810_v55 = vld [vmem:[#allocation2 + $0x750] sm:$0xff]  }
  0xd0   :  { %3470 = vmatprep.subr.bf16.mxu1 %v3765_v56  ;;  %v3809_v56 = vld [vmem:[#allocation2 + $0x788] sm:$0xff]  }
  0xd2   :  { %3449 = vmatpush3.bf16.msra.mxu0 %v3766_v57  ;;  %v3811_v57 = vld [vmem:[#allocation2 + $0x7d0] sm:$0xff]  }
  0xd3   :  { %3478 = vmatprep.subr.bf16.mxu0 %v3769_v62  ;;  %3471 = vmatpush3.bf16.msra.mxu1 %v3767_v59  ;;  %v3814_v59 = vld [vmem:[#allocation2 + $0x758] sm:$0xff]  }
  0xd4   :  { %3500 = vmatprep.subr.bf16.mxu1 %v3770_v1  ;;  %v3816_v62 = vld [vmem:[#allocation2 + $0x718] sm:$0xff]   ;;  %v3819_v1 = vld [vmem:[#allocation2 + $0x7e0] sm:$0xff]  }
  0xd5   :  { %2734 = vmatmul.mubr.bf16.vlgmr.msra.gmra.mrb[20].mxu0 %v234_v2  ;;  %v3820_v2 = vld [vmem:[#allocation2 + $0x720] sm:$0xff]  }
  0xd6   :  { %3479 = vmatpush3.bf16.msra.mxu0 %v3771_v3  ;;  %2774 = vmatmul.mubr.bf16.vlgmr.msra.gmra.mrb[20].mxu1 %v236_v7  ;;  %v3822_v3 = vld [vmem:[#allocation2 + $0x768] sm:$0xff]  }
  0xd7   :  { %3480 = vmatprep.subr.bf16.mxu0 %v3773_v8  ;;  %3501 = vmatpush3.bf16.msra.mxu1 %v3772_v6  ;;  %v3823_v6 = vld [vmem:[#allocation2 + $0x7e8] sm:$0xff]  }
  0xd8   :  { %3502 = vmatprep.subr.bf16.mxu1 %v3774_v10  ;;  %2813 = vmatprep.mubr.bf16.mxu0 %v239_v46  ;;  %v3824_v8 = vld [vmem:[#allocation2 + $0x728] sm:$0xff]   ;;  %v3826_v10 = vld [vmem:[#allocation2 + $0x770] sm:$0xff]  }
  0xd9   :  { %2853 = vmatprep.mubr.bf16.mxu1 %v241_v51 }
  0xda   :  { %3481 = vmatpush3.bf16.msra.mxu0 %v3775_v11 }
  0xdb   :  { %3482 = vmatprep.subr.bf16.mxu0 %v3777_v13  ;;  %3503 = vmatpush3.bf16.msra.mxu1 %v3776_v12 }
  0xdc   :  { %3504 = vmatprep.subr.bf16.mxu1 %v3778_v14  ;;  %v3825_v14 = vld [vmem:[#allocation2 + $0x7a8] sm:$0xff]  }
  0xde   :  { %3483 = vmatpush3.bf16.msra.mxu0 %v3779_v15  ;;  %v3827_v15 = vld [vmem:[#allocation2 + $0x7f0] sm:$0xff]  }
  0xdf   :  { %3484 = vmatprep.subr.bf16.mxu0 %v3781_v17  ;;  %3505 = vmatpush3.bf16.msra.mxu1 %v3780_v16 }
  0xe0   :  { %3506 = vmatprep.subr.bf16.mxu1 %v3782_v18 }
  0xe2   :  { %3485 = vmatpush3.bf16.msra.mxu0 %v3783_v19 }
  0xe3   :  { %3486 = vmatprep.subr.bf16.mxu0 %v3785_v21  ;;  %3507 = vmatpush3.bf16.msra.mxu1 %v3784_v20  ;;  %v3828_v21 = vld [vmem:[#allocation2 + $0x730] sm:$0xff]  }
  0xe4   :  { %3508 = vmatprep.subr.bf16.mxu1 %v3786_v22 }
  0xe6   :  { %3487 = vmatpush3.bf16.msra.mxu0 %v3787_v23  ;;  %v3830_v23 = vld [vmem:[#allocation2 + $0x778] sm:$0xff]  }
  0xe7   :  { %3488 = vmatprep.subr.bf16.mxu0 %v3789_v25  ;;  %3509 = vmatpush3.bf16.msra.mxu1 %v3788_v24  ;;  %v3829_v25 = vld [vmem:[#allocation2 + $0x7b0] sm:$0xff]  }
  0xe8   :  { %3510 = vmatprep.subr.bf16.mxu1 %v3790_v26  ;;  %v3831_v26 = vld [vmem:[#allocation2 + $0x7f8] sm:$0xff]  }
  0xea   :  { %3489 = vmatpush3.bf16.msra.mxu0 %v3791_v27  ;;  %v3832_v27 = vld [vmem:[#allocation2 + $0x738] sm:$0xff]  }
  0xeb   :  { %3490 = vmatprep.subr.bf16.mxu0 %v3793_v29  ;;  %3511 = vmatpush3.bf16.msra.mxu1 %v3792_v28  ;;  %v37_v28 = vld [vmem:[%s3977_s0 + $0x38] sm:$0xff]  ;;  %s3887_s0 = smov [#allocation5]  }
  0xec   :  { %3512 = vmatprep.subr.bf16.mxu1 %v3794_v30  ;;  %v172_v29 = vrot.slane %v37_v28, %v3920_v35  ;;  %v165_v30 = vcombine.high %v37_v28, %v37_v28  ;;  %s2948_s15 = sshll.u32 %s3887_s0, 4  ;;  %s2949_s15 = int_to_ptr.vmem [resolvable:$true] %s2948_s15 }
  0xed   :  { %s3857_s16 = scalar_lea.vmem %s2949_s15, 32  ;;  %p3862_p9 = scmp.lt.s32.totalorder %s2949_s15, %s2949_s15 }
  0xee   :  { %3491 = vmatpush3.bf16.msra.mxu0 %v3795_v31  ;;  %v3833_v31 = vld [vmem:[#allocation2 + $0x7b8] sm:$0xff]   ;;  %p3858_p8 = scmp.ne.s32.totalorder %s2949_s15, %s3857_s16  ;;  %p3863_p10 = scmp.lt.s32.totalorder %s3857_s16, %s3857_s16 }
  0xef   :  { %3492 = vmatprep.subr.bf16.mxu0 %v3797_v33  ;;  %3513 = vmatpush3.bf16.msra.mxu1 %v3796_v32  ;;  %v180_v32 = vcombine.high %v172_v29, %v172_v29  ;;  %v179_v33 = vrot.slane %v165_v30, %v3920_v35 }
  0xf0   :  { %3514 = vmatprep.subr.bf16.mxu1 %v3798_v34  ;;  %v242_v34 = vpack.c.bf16 %v172_v29, %v172_v29  ;;  %p3864_p11 = por %p3863_p10, %p3862_p9 }
  0xf1   :  { %v181_v37 = vcombine.high %v179_v33, %v179_v33  ;;  %v244_v38 = vpack.c.bf16 %v179_v33, %v179_v33 }
  0xf2   :  { %3493 = vmatpush3.bf16.msra.mxu0 %v3799_v36  ;;  %v243_v36 = vpack.c.bf16 %v180_v32, %v180_v32  ;;  %p3865_p12 = pnand %p3864_p11, %p3858_p8 }
  0xf3   :  { %3522 = vmatprep.subr.bf16.mxu0 %v3802_v40  ;;  %3515 = vmatpush3.bf16.msra.mxu1 %v3800_v41  ;;  %v245_v39 = vpack.c.bf16 %v181_v37, %v181_v37 }
  0xf4   :  { %3544 = vmatprep.subr.bf16.mxu1 %v3803_v44 }
  0xf5   :  { %2814 = vmatmul.mubr.bf16.vlgmr.msra.gmra.mrb[24].mxu0 %v238_v45 }
  0xf6   :  { %3523 = vmatpush3.bf16.msra.mxu0 %v3804_v48  ;;  %2854 = vmatmul.mubr.bf16.vlgmr.msra.gmra.mrb[24].mxu1 %v240_v49 }
  0xf7   :  { %3524 = vmatprep.subr.bf16.mxu0 %v3806_v50  ;;  %3545 = vmatpush3.bf16.msra.mxu1 %v3805_v52 }
  0xf8   :  { %3546 = vmatprep.subr.bf16.mxu1 %v3807_v53  ;;  %2893 = vmatprep.mubr.bf16.mxu0 %v243_v36 }
  0xf9   :  { %2933 = vmatprep.mubr.bf16.mxu1 %v245_v39 }
  0xfa   :  { %3525 = vmatpush3.bf16.msra.mxu0 %v3808_v54 }
  0xfb   :  { %3526 = vmatprep.subr.bf16.mxu0 %v3810_v55  ;;  %3547 = vmatpush3.bf16.msra.mxu1 %v3809_v56 }
  0xfc   :  { %3548 = vmatprep.subr.bf16.mxu1 %v3811_v57 }
  0xfe   :  { %3527 = vmatpush3.bf16.msra.mxu0 %v3812_v58 }
  0xff   :  { %3528 = vmatprep.subr.bf16.mxu0 %v3814_v59  ;;  %3549 = vmatpush3.bf16.msra.mxu1 %v3813_v60 }
 0x100   :  { %3550 = vmatprep.subr.bf16.mxu1 %v3815_v61 }
 0x102   :  { %3529 = vmatpush3.bf16.msra.mxu0 %v3816_v62 }
 0x103   :  { %3530 = vmatprep.subr.bf16.mxu0 %v3818_v63  ;;  %3551 = vmatpush3.bf16.msra.mxu1 %v3817_v0 }
 0x104   :  { %3552 = vmatprep.subr.bf16.mxu1 %v3819_v1 }
 0x106   :  { %3531 = vmatpush3.bf16.msra.mxu0 %v3820_v2 }
 0x107   :  { %3532 = vmatprep.subr.bf16.mxu0 %v3822_v3  ;;  %3553 = vmatpush3.bf16.msra.mxu1 %v3821_v4 }
 0x108   :  { %v3230_v7 = vpop.f32.mrb[0].mxu0  ;;  %3554 = vmatprep.subr.bf16.mxu1 %v3823_v6 }
 0x109   :  { %v3231_v9 = vpop.f32.mrb[1].mxu0  ;;  %v3252_v11 = vpop.f32.mrb[0].mxu1 }
 0x10a   :  { %v3232_v12 = vadd.f32 %v3231_v9, %v3230_v7  ;;  %v3233_v13 = vpop.f32.mrb[2].mxu0  ;;  %v3253_v16 = vpop.f32.mrb[1].mxu1  ;;  %3533 = vmatpush3.bf16.msra.mxu0 %v3824_v8 }
 0x10b   :  { %v3234_v17 = vpop.f32.mrb[3].mxu0  ;;  %v3254_v19 = vadd.f32 %v3253_v16, %v3252_v11  ;;  %v3255_v20 = vpop.f32.mrb[2].mxu1  ;;  %3534 = vmatprep.subr.bf16.mxu0 %v3826_v10  ;;  %3555 = vmatpush3.bf16.msra.mxu1 %v3825_v14 }
 0x10c   :  { %v2336_v18 = vadd.f32 %v3232_v12, %v2957_v5  ;;  %v3256_v22 = vpop.f32.mrb[3].mxu1  ;;  %3556 = vmatprep.subr.bf16.mxu1 %v3827_v15 }
 0x10e   :  { %v2376_v24 = vadd.f32 %v3254_v19, %v2336_v18  ;;  %3535 = vmatpush3.bf16.msra.mxu0 %v3828_v21 }
 0x10f   :  { %3536 = vmatprep.subr.bf16.mxu0 %v3830_v23  ;;  %3557 = vmatpush3.bf16.msra.mxu1 %v3829_v25 }
 0x110   :  { %3558 = vmatprep.subr.bf16.mxu1 %v3831_v26 }
 0x112   :  { %3537 = vmatpush3.bf16.msra.mxu0 %v3832_v27 }
 0x113   :  { %3559 = vmatpush3.bf16.msra.mxu1 %v3833_v31 }
 0x115   :  { %2894 = vmatmul.mubr.bf16.vlgmr.msra.gmra.mrb[28].mxu0 %v242_v34 }
 0x116   :  { %2934 = vmatmul.mubr.bf16.vlgmr.msra.gmra.mrb[28].mxu1 %v244_v38 }
 0x128   :  { %v3274_v40 = vpop.f32.mrb[4].mxu0 }
 0x129   :  { %v3275_v41 = vpop.f32.mrb[5].mxu0  ;;  %v3296_v42 = vpop.f32.mrb[4].mxu1 }
 0x12a   :  { %v3276_v43 = vadd.f32 %v3275_v41, %v3274_v40  ;;  %v3277_v44 = vpop.f32.mrb[6].mxu0  ;;  %v3297_v45 = vpop.f32.mrb[5].mxu1 }
 0x12b   :  { %v3278_v46 = vpop.f32.mrb[7].mxu0  ;;  %v3298_v35 = vadd.f32 %v3297_v45, %v3296_v42  ;;  %v3299_v48 = vpop.f32.mrb[6].mxu1 }
 0x12c   :  { %v2416_v47 = vadd.f32 %v3276_v43, %v2376_v24  ;;  %v3300_v49 = vpop.f32.mrb[7].mxu1 }
 0x12e   :  { %v2456_v50 = vadd.f32 %v3298_v35, %v2416_v47 }
 0x148   :  { %v3318_v51 = vpop.f32.mrb[8].mxu0 }
 0x149   :  { %v3319_v52 = vpop.f32.mrb[9].mxu0  ;;  %v3340_v53 = vpop.f32.mrb[8].mxu1 }
 0x14a   :  { %v3320_v54 = vadd.f32 %v3319_v52, %v3318_v51  ;;  %v3321_v55 = vpop.f32.mrb[10].mxu0  ;;  %v3341_v56 = vpop.f32.mrb[9].mxu1 }
 0x14b   :  { %v3322_v57 = vpop.f32.mrb[11].mxu0  ;;  %v3342_v59 = vadd.f32 %v3341_v56, %v3340_v53  ;;  %v3343_v60 = vpop.f32.mrb[10].mxu1 }
 0x14c   :  { %v2496_v58 = vadd.f32 %v3320_v54, %v2456_v50  ;;  %v3344_v61 = vpop.f32.mrb[11].mxu1 }
 0x14e   :  { %v2536_v62 = vadd.f32 %v3342_v59, %v2496_v58 }
 0x168   :  { %v3362_v63 = vpop.f32.mrb[12].mxu0 }
 0x169   :  { %v3363_v0 = vpop.f32.mrb[13].mxu0  ;;  %v3384_v1 = vpop.f32.mrb[12].mxu1 }
 0x16a   :  { %v3364_v2 = vadd.f32 %v3363_v0, %v3362_v63  ;;  %v3365_v3 = vpop.f32.mrb[14].mxu0  ;;  %v3385_v4 = vpop.f32.mrb[13].mxu1 }
 0x16b   :  { %v3366_v5 = vpop.f32.mrb[15].mxu0  ;;  %v3386_v7 = vadd.f32 %v3385_v4, %v3384_v1  ;;  %v3387_v8 = vpop.f32.mrb[14].mxu1 }
 0x16c   :  { %v2576_v6 = vadd.f32 %v3364_v2, %v2536_v62  ;;  %v3388_v9 = vpop.f32.mrb[15].mxu1 }
 0x16e   :  { %v2616_v10 = vadd.f32 %v3386_v7, %v2576_v6 }
 0x188   :  { %v3406_v11 = vpop.f32.mrb[16].mxu0 }
 0x189   :  { %v3407_v12 = vpop.f32.mrb[17].mxu0  ;;  %v3428_v13 = vpop.f32.mrb[16].mxu1 }
 0x18a   :  { %v3408_v14 = vadd.f32 %v3407_v12, %v3406_v11  ;;  %v3409_v15 = vpop.f32.mrb[18].mxu0  ;;  %v3429_v16 = vpop.f32.mrb[17].mxu1 }
 0x18b   :  { %v3410_v17 = vpop.f32.mrb[19].mxu0  ;;  %v3430_v19 = vadd.f32 %v3429_v16, %v3428_v13  ;;  %v3431_v20 = vpop.f32.mrb[18].mxu1 }
 0x18c   :  { %v2656_v18 = vadd.f32 %v3408_v14, %v2616_v10  ;;  %v3432_v21 = vpop.f32.mrb[19].mxu1 }
 0x18e   :  { %v2696_v22 = vadd.f32 %v3430_v19, %v2656_v18 }
 0x1a8   :  { %v3450_v23 = vpop.f32.mrb[20].mxu0 }
 0x1a9   :  { %v3451_v24 = vpop.f32.mrb[21].mxu0  ;;  %v3472_v25 = vpop.f32.mrb[20].mxu1 }
 0x1aa   :  { %v3452_v26 = vadd.f32 %v3451_v24, %v3450_v23  ;;  %v3453_v27 = vpop.f32.mrb[22].mxu0  ;;  %v3473_v28 = vpop.f32.mrb[21].mxu1 }
 0x1ab   :  { %v3454_v29 = vpop.f32.mrb[23].mxu0  ;;  %v3474_v31 = vadd.f32 %v3473_v28, %v3472_v25  ;;  %v3475_v32 = vpop.f32.mrb[22].mxu1 }
 0x1ac   :  { %v2736_v30 = vadd.f32 %v3452_v26, %v2696_v22  ;;  %v3476_v33 = vpop.f32.mrb[23].mxu1 }
 0x1ae   :  { %v2776_v34 = vadd.f32 %v3474_v31, %v2736_v30 }
 0x1c8   :  { %v3494_v36 = vpop.f32.mrb[24].mxu0 }
 0x1c9   :  { %v3495_v37 = vpop.f32.mrb[25].mxu0  ;;  %v3516_v38 = vpop.f32.mrb[24].mxu1 }
 0x1ca   :  { %v3496_v39 = vadd.f32 %v3495_v37, %v3494_v36  ;;  %v3497_v40 = vpop.f32.mrb[26].mxu0  ;;  %v3517_v41 = vpop.f32.mrb[25].mxu1 }
 0x1cb   :  { %v3498_v42 = vpop.f32.mrb[27].mxu0  ;;  %v3518_v44 = vadd.f32 %v3517_v41, %v3516_v38  ;;  %v3519_v45 = vpop.f32.mrb[26].mxu1 }
 0x1cc   :  { %v2816_v43 = vadd.f32 %v3496_v39, %v2776_v34  ;;  %v3520_v46 = vpop.f32.mrb[27].mxu1 }
 0x1ce   :  { %v2856_v47 = vadd.f32 %v3518_v44, %v2816_v43 }
 0x1e8   :  { %v3538_v35 = vpop.f32.mrb[28].mxu0 }
 0x1e9   :  { %v3539_v48 = vpop.f32.mrb[29].mxu0  ;;  %v3560_v49 = vpop.f32.mrb[28].mxu1 }
 0x1ea   :  { %v3540_v50 = vadd.f32 %v3539_v48, %v3538_v35  ;;  %v3541_v51 = vpop.f32.mrb[30].mxu0  ;;  %v3561_v52 = vpop.f32.mrb[29].mxu1 }
 0x1eb   :  { %v3542_v53 = vpop.f32.mrb[31].mxu0  ;;  %v3562_v55 = vadd.f32 %v3561_v52, %v3560_v49  ;;  %v3563_v56 = vpop.f32.mrb[30].mxu1 }
 0x1ec   :  { %v2896_v54 = vadd.f32 %v3540_v50, %v2856_v47  ;;  %v3564_v57 = vpop.f32.mrb[31].mxu1 }
 0x1ee   :  { %v2936_v58 = vadd.f32 %v3562_v55, %v2896_v54 }
 0x1f0   :  { %2941 = vst [vmem:[#allocation5] sm:$0x3] %v2936_v58 }
 0x1f1   :  { %3868 = shalt.err (!%p3865_p12)
}
 0x1f2   :  { %s3869_s19 = scalar_lea.hbm %s3980_s3, 32 }
 0x1f3   :  { %p3870_p13 = scmp.ne.s32.totalorder %s3980_s3, %s3869_s19  ;;  %p3873_p0 = scmp.lt.u32.totalorder %s3869_s19, %s3980_s3 }
 0x1f5   :  { %p3875_p1 = pnand %p3873_p0, %p3870_p13 }
 0x1f7   :  { %3878 = shalt.err (!%p3875_p1)
}
 0x1f8   :  { %2951 = dma.vmem_to_hbm [thread:$0]  %s2949_s15, 32, %s3980_s3, [#allocation4]  }
 0x1f9   :  { %3881 = dma.done.wait [#allocation4], 32  }
 0x1fa   :  { %3882 = vsyncadd [#allocation4], 4294967264 }
 0x1fb   :  { %2955 = vsyncpa [#allocation3], 1 }
 0x1fc   :  { %2956 = vsyncpa [#allocation4], 1 }

</bundles_post_ra>
